<compile_context>
chip_gen: v7x
topology: tpu7x:2x2x1
jax: 0.10.0
libtpu: 0.0.40
codegen_flags: <defaults>
</compile_context>

<pallas_src>
import functools

import jax
import jax.numpy as jnp
from jax.experimental import pallas as pl
from jax.experimental.pallas import tpu as pltpu


def _prelu(v, a):
    # PyTorch PReLU alpha is unconstrained, so keep the exact where() form
    # (jnp.maximum(v, a*v) is only equivalent for 0 <= alpha <= 1).
    return jnp.where(v >= 0, v, a * v)


# ---------------------------------------------------------------------------
# Fused path: whole image (all of HW) resident per grid step.
# ---------------------------------------------------------------------------
def _fused_kernel(x_ref, w1_ref, wd_ref, wu_ref, w2_ref, a1_ref, a2_ref,
                  o_ref, *, batch_tile):
    # x_ref : (Bt, Cin, HW)   f32   (HW on lanes)
    # w1_ref: (4C, Cin)       bf16
    # wd_ref: (Cq, 4C)        f32
    # wu_ref: (4C, Cq)        f32
    # w2_ref: (Cout, 4C)      bf16
    # a1/a2 : (1,)            f32 SMEM scalar PReLU alphas
    # o_ref : (Bt, Cout, HW)  bf16
    a1 = a1_ref[0]
    a2 = a2_ref[0]
    w1 = w1_ref[...]
    wd = wd_ref[...]
    wu = wu_ref[...]
    w2 = w2_ref[...]

    def body(b, carry):
        x = x_ref[b].astype(jnp.bfloat16)                              # (Cin, HW)
        # trans1: 1x1 conv (MXU bf16 -> f32 acc) + PReLU
        ex = _prelu(jnp.dot(w1, x, preferred_element_type=jnp.float32), a1)
        # squeeze-excite (tiny, f32)
        pooled = jnp.mean(ex, axis=1, keepdims=True)                   # (4C, 1)
        # TODO(synk): at batch_tile == 1 the two tiny matvecs are exposed
        # serial latency; could be moved onto the VPU if that ever dominates.
        d = jnp.dot(wd, pooled, preferred_element_type=jnp.float32)    # (Cq, 1)
        d = d * jax.nn.sigmoid(d)                                      # swish
        u = jnp.dot(wu, d, preferred_element_type=jnp.float32)         # (4C, 1)
        wgt = jax.nn.sigmoid(u)
        # apply attention (lane broadcast) fused with bf16 downcast for MXU
        scaled = (ex * wgt).astype(jnp.bfloat16)                       # (4C, HW)
        # trans2: 1x1 conv + PReLU, emit bf16
        y = jnp.dot(w2, scaled, preferred_element_type=jnp.float32)    # (Cout,HW)
        o_ref[b] = _prelu(y, a2).astype(o_ref.dtype)
        return carry

    # fori_loop bounds live ranges of the big f32 intermediates; unroll only
    # while small so LLO keeps visibility without vreg/VMEM blowup.
    jax.lax.fori_loop(0, batch_tile, body, 0, unroll=(batch_tile <= 4))


# ---------------------------------------------------------------------------
# HW-tiled two-pass path (large feature maps).
# ---------------------------------------------------------------------------
def _pool_kernel(x_ref, w1_ref, a1_ref, psum_ref, *, hw, hw_tile):
    # grid (N, nhw); axis 1 is the HW reduction ('arbitrary').
    # x_ref   : (1, Cin, hw_tile) f32
    # psum_ref: (1, 4C, 1)        f32, resident accumulator across axis 1
    k = pl.program_id(1)

    @pl.when(k == 0)
    def _():
        psum_ref[...] = jnp.zeros_like(psum_ref)

    a1 = a1_ref[0]
    x = x_ref[0].astype(jnp.bfloat16)                                  # (Cin, hwt)
    ex = _prelu(jnp.dot(w1_ref[...], x, preferred_element_type=jnp.float32), a1)
    # Mask lanes past the true HW extent (last chunk may be padded / garbage).
    col = jax.lax.broadcasted_iota(jnp.int32, (1, hw_tile), 1) + k * hw_tile
    ex = jnp.where(col < hw, ex, 0.0)
    psum_ref[0] = psum_ref[0] + jnp.sum(ex, axis=1, keepdims=True)     # (4C, 1)


def _apply_kernel(x_ref, wgt_ref, w1_ref, w2_ref, a1_ref, a2_ref, o_ref):
    # x_ref  : (1, Cin, hw_tile)  f32
    # wgt_ref: (1, 4C, 1)         f32 precomputed sigmoid attention weights
    # o_ref  : (1, Cout, hw_tile) bf16
    a1 = a1_ref[0]
    a2 = a2_ref[0]
    x = x_ref[0].astype(jnp.bfloat16)
    # Recompute ex for this chunk (cheaper than round-tripping f32 ex via HBM).
    ex = _prelu(jnp.dot(w1_ref[...], x, preferred_element_type=jnp.float32), a1)
    scaled = (ex * wgt_ref[0]).astype(jnp.bfloat16)
    y = jnp.dot(w2_ref[...], scaled, preferred_element_type=jnp.float32)
    o_ref[0] = _prelu(y, a2).astype(o_ref.dtype)


# ---------------------------------------------------------------------------
# Wrapper
# ---------------------------------------------------------------------------
def _vmem_plan():
    """Generation-aware (block_budget, vmem_limit, two_core_chip)."""
    try:
        cap = int(getattr(pltpu.get_tpu_info(), "vmem_capacity_bytes", 64 << 20))
    except Exception:
        cap = 64 << 20
    if cap <= (80 << 20):
        # v7x-class: 64 MiB/TC, 2 TensorCores -> tighter budget, keep grid >= 2.
        return (24 << 20), (40 << 20), True
    # v5e / v6e: 128 MiB/TC, single TensorCore -> large blocks are free wins.
    return (40 << 20), (100 << 20), False


def channel_attention(x_nchw, params, *, out_dtype=jnp.bfloat16,
                      force_hw_tiled=False, max_hw_tile=None):
    """x_nchw: (N, Cin, H, W) float32. Returns (N, Cout, H, W) out_dtype."""
    N, Cin, H, W = x_nchw.shape
    HW = H * W
    C4 = Cin * 4
    Cq = Cin // 4
    Cout = params["w2"].shape[0]

    block_budget, vmem_limit, two_core = _vmem_plan()

    # NCHW kept: flatten spatial so HW sits on the lane (last) dim.  f32 input
    # goes straight in; the bf16 downcast happens per block inside the kernel
    # (no extra host-side astype HBM round trip).
    x = x_nchw.reshape(N, Cin, HW)

    # 1x1 conv weights (out, in, 1, 1) -> (out, in); y = W @ x, no transposes.
    w1 = params["w1"].reshape(C4, Cin).astype(jnp.bfloat16)
    wd = params["wd"].reshape(Cq, C4).astype(jnp.float32)
    wu = params["wu"].reshape(C4, Cq).astype(jnp.float32)
    w2 = params["w2"].reshape(Cout, C4).astype(jnp.bfloat16)
    a1 = params["a1"].reshape(1).astype(jnp.float32)
    a2 = params["a2"].reshape(1).astype(jnp.float32)

    weight_bytes = (C4 * Cin + Cout * C4) * 2 + (Cq * C4 + C4 * Cq) * 4

    # --- fused-path VMEM model (no double counting: I/O double-buffer here,
    # intermediates counted by live loop iterations, limit set separately) ---
    io_per_img = 2 * (Cin * HW * 4) + 2 * (Cout * HW * 2)
    interm_per_img = Cin * HW * 2 + C4 * HW * (4 + 2) + Cout * HW * 4

    def fused_step_bytes(bt):
        live = (bt if bt <= 4 else 2) * interm_per_img   # unrolled iters live
        return bt * io_per_img + live + weight_bytes

    use_fused = (not force_hw_tiled) and fused_step_bytes(1) <= block_budget

    if use_fused:
        # Pack as many images per step as the budget allows (amortize ~0.35us
        # per-step overhead); on 2-TC chips keep the grid length >= 2.
        b_cap = max(1, N // 2) if two_core else N
        b_cap = min(b_cap, 16)
        b_tile = 1
        for cand in range(1, b_cap + 1):
            if fused_step_bytes(cand) <= block_budget:
                b_tile = cand
        grid = (pl.cdiv(N, b_tile),)   # partial last block: OOB writes dropped

        kernel = functools.partial(_fused_kernel, batch_tile=b_tile)
        out = pl.pallas_call(
            kernel,
            out_shape=jax.ShapeDtypeStruct((N, Cout, HW), out_dtype),
            grid=grid,
            in_specs=[
                pl.BlockSpec((b_tile, Cin, HW), lambda i: (i, 0, 0)),
                pl.BlockSpec((C4, Cin), lambda i: (0, 0)),
                pl.BlockSpec((Cq, C4), lambda i: (0, 0)),
                pl.BlockSpec((C4, Cq), lambda i: (0, 0)),
                pl.BlockSpec((Cout, C4), lambda i: (0, 0)),
                pl.BlockSpec(memory_space=pltpu.MemorySpace.SMEM),
                pl.BlockSpec(memory_space=pltpu.MemorySpace.SMEM),
            ],
            out_specs=pl.BlockSpec((b_tile, Cout, HW), lambda i: (i, 0, 0)),
            compiler_params=pltpu.CompilerParams(
                dimension_semantics=("parallel",),
                vmem_limit_bytes=vmem_limit),
        )(x, w1, wd, wu, w2, a1, a2)
        return out.reshape(N, Cout, H, W)

    # --- HW-tiled two-pass path -------------------------------------------
    def tiled_step_bytes(hw_t):
        io = 2 * (Cin * hw_t * 4) + 2 * (Cout * hw_t * 2) + 2 * (C4 * 4)
        interm = Cin * hw_t * 2 + C4 * hw_t * (4 + 2) + Cout * hw_t * 4
        return io + interm + weight_bytes

    max_hw = pl.cdiv(HW, 128) * 128
    if max_hw_tile is not None:
        max_hw = min(max_hw, max(128, (max_hw_tile // 128) * 128))
    hw_tile = 128
    cand = 128
    while cand <= max_hw:
        if tiled_step_bytes(cand) <= block_budget:
            hw_tile = cand
        cand += 128
    nhw = pl.cdiv(HW, hw_tile)

    # Pass 1: accumulate sum over HW of PReLU(W1 @ x) per (image, channel).
    pool = functools.partial(_pool_kernel, hw=HW, hw_tile=hw_tile)
    psum = pl.pallas_call(
        pool,
        out_shape=jax.ShapeDtypeStruct((N, C4, 1), jnp.float32),
        grid=(N, nhw),
        in_specs=[
            pl.BlockSpec((1, Cin, hw_tile), lambda i, k: (i, 0, k)),
            pl.BlockSpec((C4, Cin), lambda i, k: (0, 0)),
            pl.BlockSpec(memory_space=pltpu.MemorySpace.SMEM),
        ],
        out_specs=pl.BlockSpec((1, C4, 1), lambda i, k: (i, 0, 0)),
        compiler_params=pltpu.CompilerParams(
            dimension_semantics=("parallel", "arbitrary"),
            vmem_limit_bytes=vmem_limit),
    )(x, w1, a1)

    # Tiny squeeze MLP on (N, 4C): plain JAX (negligible work).
    pooled = psum / jnp.float32(HW)                                  # (N,4C,1)
    d = jnp.einsum("qc,ncx->nqx", wd, pooled)
    d = d * jax.nn.sigmoid(d)
    wgt = jax.nn.sigmoid(jnp.einsum("cq,nqx->ncx", wu, d))           # (N,4C,1)

    # Pass 2: re-read x, recompute ex per chunk, apply weights + trans2.
    out = pl.pallas_call(
        _apply_kernel,
        out_shape=jax.ShapeDtypeStruct((N, Cout, HW), out_dtype),
        grid=(N, nhw),
        in_specs=[
            pl.BlockSpec((1, Cin, hw_tile), lambda i, k: (i, 0, k)),
            pl.BlockSpec((1, C4, 1), lambda i, k: (i, 0, 0)),
            pl.BlockSpec((C4, Cin), lambda i, k: (0, 0)),
            pl.BlockSpec((Cout, C4), lambda i, k: (0, 0)),
            pl.BlockSpec(memory_space=pltpu.MemorySpace.SMEM),
            pl.BlockSpec(memory_space=pltpu.MemorySpace.SMEM),
        ],
        out_specs=pl.BlockSpec((1, Cout, hw_tile), lambda i, k: (i, 0, k)),
        compiler_params=pltpu.CompilerParams(
            dimension_semantics=("parallel", "parallel"),
            vmem_limit_bytes=vmem_limit),
    )(x, wgt, w1, w2, a1, a2)

    return out.reshape(N, Cout, H, W)


# ---------------------------------------------------------------------------
# Reference / params / test
# ---------------------------------------------------------------------------
def _reference(x_nchw, params):
    """Pure-JAX f32 reference of the PyTorch forward (for verification)."""
    N, Cin, H, W = x_nchw.shape
    C4 = Cin * 4
    Cq = Cin // 4
    Cout = params["w2"].shape[0]
    prelu = lambda v, a: jnp.where(v >= 0, v, a * v)
    x = x_nchw.reshape(N, Cin, H * W)
    w1 = params["w1"].reshape(C4, Cin)
    wd = params["wd"].reshape(Cq, C4)
    wu = params["wu"].reshape(C4, Cq)
    w2 = params["w2"].reshape(Cout, C4)
    ex = prelu(jnp.einsum("oc,bch->boh", w1, x), params["a1"])
    pooled = jnp.mean(ex, axis=-1, keepdims=True)
    d = jnp.einsum("qo,boh->bqh", wd, pooled)
    d = d * jax.nn.sigmoid(d)
    u = jnp.einsum("oq,bqh->boh", wu, d)
    wgt = jax.nn.sigmoid(u)
    y = prelu(jnp.einsum("oc,bch->boh", w2, ex * wgt), params["a2"])
    return y.reshape(N, Cout, H, W)


def init_params(key, in_channels, out_channels):
    C4 = in_channels * 4
    Cq = in_channels // 4
    k1, k2, k3, k4 = jax.random.split(key, 4)
    # Conv2d weight layout: (out, in, 1, 1); all convs bias=False as in the module.
    return {
        "w1": 0.1 * jax.random.normal(k1, (C4, in_channels, 1, 1), jnp.float32),
        "wd": 0.1 * jax.random.normal(k2, (Cq, C4, 1, 1), jnp.float32),
        "wu": 0.1 * jax.random.normal(k3, (C4, Cq, 1, 1), jnp.float32),
        "w2": 0.1 * jax.random.normal(k4, (out_channels, C4, 1, 1), jnp.float32),
        "a1": jnp.array([0.25], jnp.float32),   # nn.PReLU() default scalar 0.25
        "a2": jnp.array([0.25], jnp.float32),
    }


if __name__ == "__main__":
    key = jax.random.PRNGKey(0)
    kx, kp = jax.random.split(key)

    N, Cin, H, W = 2, 4, 16, 16
    Cout = 8
    x = jax.random.normal(kx, (N, Cin, H, W), jnp.float32)
    params = init_params(kp, Cin, Cout)
    y_ref = _reference(x, params)

    # 1) Fused single-kernel path (default).
    y = jax.block_until_ready(channel_attention(x, params))
    assert y.shape == (N, Cout, H, W)
    assert jnp.allclose(y.astype(jnp.float32), y_ref, atol=3e-2, rtol=3e-2), \
        "fused path mismatch vs reference"

    # 2) HW-tiled two-pass path (forced; exercises pool + apply kernels).
    y_t = jax.block_until_ready(
        channel_attention(x, params, force_hw_tiled=True, max_hw_tile=128))
    assert jnp.allclose(y_t.astype(jnp.float32), y_ref, atol=3e-2, rtol=3e-2), \
        "tiled path mismatch vs reference"

    # 3) Tiled path with HW not a multiple of 128 (exercises lane masking).
    x2 = jax.random.normal(kx, (N, Cin, 12, 12), jnp.float32)
    y2_ref = _reference(x2, params)
    y2 = jax.block_until_ready(
        channel_attention(x2, params, force_hw_tiled=True, max_hw_tile=128))
    assert jnp.allclose(y2.astype(jnp.float32), y2_ref, atol=3e-2, rtol=3e-2), \
        "tiled path (masked) mismatch vs reference"

    print("KERNEL_OK")
</pallas_src>

<mosaic_0001>
module attributes {stable_mosaic.version = 11 : i64} {
  func.func @_fused_kernel(%arg0: i32, %arg1: memref<1x4x256xf32, #tpu.memory_space<vmem>>, %arg2: memref<16x4xbf16, #tpu.memory_space<vmem>>, %arg3: memref<1x16xf32, #tpu.memory_space<vmem>>, %arg4: memref<16x1xf32, #tpu.memory_space<vmem>>, %arg5: memref<8x16xbf16, #tpu.memory_space<vmem>>, %arg6: memref<1xf32, #tpu.memory_space<smem>>, %arg7: memref<1xf32, #tpu.memory_space<smem>>, %arg8: memref<1x8x256xbf16, #tpu.memory_space<vmem>>) attributes {dimension_semantics = [#tpu.dimension_semantics<parallel>], iteration_bounds = array<i64: 2>, scalar_prefetch = 0 : i64, scratch_operands = 0 : i64, tpu.core_type = #tpu.core_type<tc>, window_params = [{transform_indices = @transform_0, window_bounds = array<i64: 1, 4, 256>}, {pipeline_mode = #tpu.pipeline_mode<synchronous>, transform_indices = @transform_1, window_bounds = array<i64: 16, 4>}, {pipeline_mode = #tpu.pipeline_mode<synchronous>, transform_indices = @transform_2, window_bounds = array<i64: 1, 16>}, {pipeline_mode = #tpu.pipeline_mode<synchronous>, transform_indices = @transform_3, window_bounds = array<i64: 16, 1>}, {pipeline_mode = #tpu.pipeline_mode<synchronous>, transform_indices = @transform_4, window_bounds = array<i64: 8, 16>}, {transform_indices = @transform_5, window_bounds = array<i64: 1>}, {transform_indices = @transform_6, window_bounds = array<i64: 1>}, {transform_indices = @transform_7, window_bounds = array<i64: 1, 8, 256>}]} {
    %c0 = arith.constant 0 : index
    %0 = memref.load %arg6[%c0] : memref<1xf32, #tpu.memory_space<smem>>
    %c0_0 = arith.constant 0 : index
    %1 = memref.load %arg7[%c0_0] : memref<1xf32, #tpu.memory_space<smem>>
    %c0_1 = arith.constant 0 : index
    %c0_2 = arith.constant 0 : index
    %2 = vector.load %arg2[%c0_1, %c0_2] : memref<16x4xbf16, #tpu.memory_space<vmem>>, vector<16x4xbf16>
    %c0_3 = arith.constant 0 : index
    %c0_4 = arith.constant 0 : index
    %3 = vector.load %arg3[%c0_3, %c0_4] : memref<1x16xf32, #tpu.memory_space<vmem>>, vector<1x16xf32>
    %c0_5 = arith.constant 0 : index
    %c0_6 = arith.constant 0 : index
    %4 = vector.load %arg4[%c0_5, %c0_6] : memref<16x1xf32, #tpu.memory_space<vmem>>, vector<16x1xf32>
    %c0_7 = arith.constant 0 : index
    %c0_8 = arith.constant 0 : index
    %5 = vector.load %arg5[%c0_7, %c0_8] : memref<8x16xbf16, #tpu.memory_space<vmem>>, vector<8x16xbf16>
    %c0_i32 = arith.constant 0 : i32
    %6 = arith.index_cast %c0_i32 : i32 to index
    %c0_9 = arith.constant 0 : index
    %c0_10 = arith.constant 0 : index
    %7 = vector.load %arg1[%6, %c0_9, %c0_10] : memref<1x4x256xf32, #tpu.memory_space<vmem>>, vector<1x4x256xf32>
    %8 = vector.shape_cast %7 : vector<1x4x256xf32> to vector<4x256xf32>
    %9 = arith.truncf %8 : vector<4x256xf32> to vector<4x256xbf16>
    %cst = arith.constant dense<0.000000e+00> : vector<16x256xf32>
    %10 = tpu.matmul %2, %9, %cst {dimension_numbers = #tpu.dot_dimension_numbers<[1], [0], [0], [1], [0, 0, 1, 1], [], []>} : vector<16x4xbf16>, vector<4x256xbf16>, vector<16x256xf32> -> vector<16x256xf32>
    %cst_11 = arith.constant 0.000000e+00 : f32
    %11 = vector.broadcast %cst_11 : f32 to vector<16x256xf32>
    %12 = arith.cmpf oge, %10, %11 : vector<16x256xf32>
    %13 = vector.broadcast %0 : f32 to vector<16x256xf32>
    %14 = arith.mulf %13, %10 : vector<16x256xf32>
    %15 = arith.select %12, %10, %14 : vector<16x256xi1>, vector<16x256xf32>
    %cst_12 = arith.constant dense<0.000000e+00> : vector<16xf32>
    %16 = vector.multi_reduction <add>, %15, %cst_12 [1] : vector<16x256xf32> to vector<16xf32>
    %17 = vector.shape_cast %16 : vector<16xf32> to vector<16x1xf32>
    %cst_13 = arith.constant 2.560000e+02 : f32
    %18 = vector.broadcast %cst_13 : f32 to vector<16x1xf32>
    %19 = arith.divf %17, %18 : vector<16x1xf32>
    %cst_14 = arith.constant dense<0.000000e+00> : vector<1x1xf32>
    %20 = tpu.matmul %3, %19, %cst_14 {dimension_numbers = #tpu.dot_dimension_numbers<[1], [0], [0], [1], [0, 0, 1, 1], [], []>} : vector<1x16xf32>, vector<16x1xf32>, vector<1x1xf32> -> vector<1x1xf32>
    %21 = arith.negf %20 : vector<1x1xf32>
    %22 = math.exp %21 : vector<1x1xf32>
    %cst_15 = arith.constant 1.000000e+00 : f32
    %23 = vector.broadcast %cst_15 : f32 to vector<1x1xf32>
    %24 = arith.addf %23, %22 : vector<1x1xf32>
    %25 = arith.divf %23, %24 : vector<1x1xf32>
    %26 = arith.mulf %20, %25 : vector<1x1xf32>
    %cst_16 = arith.constant dense<0.000000e+00> : vector<16x1xf32>
    %27 = tpu.matmul %4, %26, %cst_16 {dimension_numbers = #tpu.dot_dimension_numbers<[1], [0], [0], [1], [0, 0, 1, 1], [], []>} : vector<16x1xf32>, vector<1x1xf32>, vector<16x1xf32> -> vector<16x1xf32>
    %28 = arith.negf %27 : vector<16x1xf32>
    %29 = math.exp %28 : vector<16x1xf32>
    %cst_17 = arith.constant 1.000000e+00 : f32
    %30 = vector.broadcast %cst_17 : f32 to vector<16x1xf32>
    %31 = arith.addf %30, %29 : vector<16x1xf32>
    %32 = arith.divf %30, %31 : vector<16x1xf32>
    %33 = vector.broadcast %32 : vector<16x1xf32> to vector<16x256xf32>
    %34 = arith.mulf %15, %33 : vector<16x256xf32>
    %35 = arith.truncf %34 : vector<16x256xf32> to vector<16x256xbf16>
    %cst_18 = arith.constant dense<0.000000e+00> : vector<8x256xf32>
    %36 = tpu.matmul %5, %35, %cst_18 {dimension_numbers = #tpu.dot_dimension_numbers<[1], [0], [0], [1], [0, 0, 1, 1], [], []>} : vector<8x16xbf16>, vector<16x256xbf16>, vector<8x256xf32> -> vector<8x256xf32>
    %cst_19 = arith.constant 0.000000e+00 : f32
    %37 = vector.broadcast %cst_19 : f32 to vector<8x256xf32>
    %38 = arith.cmpf oge, %36, %37 : vector<8x256xf32>
    %39 = vector.broadcast %1 : f32 to vector<8x256xf32>
    %40 = arith.mulf %39, %36 : vector<8x256xf32>
    %41 = arith.select %38, %36, %40 : vector<8x256xi1>, vector<8x256xf32>
    %42 = arith.truncf %41 : vector<8x256xf32> to vector<8x256xbf16>
    %43 = arith.index_cast %c0_i32 : i32 to index
    %c0_20 = arith.constant 0 : index
    %c0_21 = arith.constant 0 : index
    %44 = vector.load %arg8[%43, %c0_20, %c0_21] : memref<1x8x256xbf16, #tpu.memory_space<vmem>>, vector<1x8x256xbf16>
    %45 = vector.shape_cast %44 : vector<1x8x256xbf16> to vector<8x256xbf16>
    %46 = vector.shape_cast %42 : vector<8x256xbf16> to vector<1x8x256xbf16>
    tpu.vector_store %arg8[%43, %c0_20, %c0_21], %46 {strides = array<i32>} : memref<1x8x256xbf16, #tpu.memory_space<vmem>>, vector<1x8x256xbf16>,
    %c1_i32 = arith.constant 1 : i32
    return
  }
  func.func @transform_0(%arg0: i32) -> (i32, i32, i32) {
    %c0_i32 = arith.constant 0 : i32
    %c0_i32_0 = arith.constant 0 : i32
    %c0_i32_1 = arith.constant 0 : i32
    return %arg0, %c0_i32, %c0_i32_0 : i32, i32, i32
  }
  func.func @transform_1(%arg0: i32) -> (i32, i32) {
    %c0_i32 = arith.constant 0 : i32
    %c0_i32_0 = arith.constant 0 : i32
    %c0_i32_1 = arith.constant 0 : i32
    return %c0_i32, %c0_i32_0 : i32, i32
  }
  func.func @transform_2(%arg0: i32) -> (i32, i32) {
    %c0_i32 = arith.constant 0 : i32
    %c0_i32_0 = arith.constant 0 : i32
    %c0_i32_1 = arith.constant 0 : i32
    return %c0_i32, %c0_i32_0 : i32, i32
  }
  func.func @transform_3(%arg0: i32) -> (i32, i32) {
    %c0_i32 = arith.constant 0 : i32
    %c0_i32_0 = arith.constant 0 : i32
    %c0_i32_1 = arith.constant 0 : i32
    return %c0_i32, %c0_i32_0 : i32, i32
  }
  func.func @transform_4(%arg0: i32) -> (i32, i32) {
    %c0_i32 = arith.constant 0 : i32
    %c0_i32_0 = arith.constant 0 : i32
    %c0_i32_1 = arith.constant 0 : i32
    return %c0_i32, %c0_i32_0 : i32, i32
  }
  func.func @transform_5(%arg0: i32) -> i32 {
    %c0_i32 = arith.constant 0 : i32
    %c0_i32_0 = arith.constant 0 : i32
    return %c0_i32 : i32
  }
  func.func @transform_6(%arg0: i32) -> i32 {
    %c0_i32 = arith.constant 0 : i32
    %c0_i32_0 = arith.constant 0 : i32
    return %c0_i32 : i32
  }
  func.func @transform_7(%arg0: i32) -> (i32, i32, i32) {
    %c0_i32 = arith.constant 0 : i32
    %c0_i32_0 = arith.constant 0 : i32
    %c0_i32_1 = arith.constant 0 : i32
    return %arg0, %c0_i32, %c0_i32_0 : i32, i32, i32
  }
}

</mosaic_0001>

<bundles_post_ra>
// kernel: tpu_custom_call.1
= control target key start
LH: loop header
LB: loop body
LE: loop exit
PB: predicated region body
PF: predicated region fallthrough
CT: control target
= control target key end

     0   :  { %s1043_s0 = inlined_call_operand.vmem [shape: f32[2,4,256], index: 0, kind: input, shape index: {}]   ;;  %s1044_s1 = inlined_call_operand.vmem [shape: bf16[16,4], index: 1, kind: input, shape index: {}]   ;;  %s1045_s2 = inlined_call_operand.vmem [shape: f32[1,16], index: 2, kind: input, shape index: {}]   ;;  %s1046_s3 = inlined_call_operand.vmem [shape: f32[16,1], index: 3, kind: input, shape index: {}]   ;;  %s1047_s4 = inlined_call_operand.vmem [shape: bf16[8,16], index: 4, kind: input, shape index: {}]   ;;  %s1048_s5 = inlined_call_operand.<no memory space> [shape: f32[1], index: 5, kind: input, shape index: {}]   ;;  %s1049_s6 = inlined_call_operand.<no memory space> [shape: f32[1], index: 6, kind: input, shape index: {}]   ;;  %s1050_s7 = inlined_call_operand.hbm [shape: bf16[2,8,256], index: 7, kind: output, shape index: {}]  }
   0x1   :  { %12 = sst [smem:[#allocation2]] %s1048_s5 }
   0x2   :  { %13 = sst [smem:[#allocation3]] %s1049_s6 }
   0x3   :  { %14 = vsyncpa [#allocation5], 0 }
   0x4   :  { %16 = vsyncpa [#allocation5 + $0x1], 0  ;;  %s926_s28 = smov 0   ;;  %s928_s29 = smov 0  }
   0x5   :  { %s930_s30 = smov 0   ;;  %s932_s8 = smov 0  }
   0x6 LB: > { %s947_s5 = sadd.s32 4294967295, %s873_s8   ;;  %s704_s6 = sadd.s32 4294967294, %s873_s8   ;;  %s873_s8 = sphi %s932_s8, %s1056_s8   ;;  %s869_s30 = sphi %s930_s30, %s1055_s30   ;;  %s865_s29 = sphi %s928_s29, %s1054_s29   ;;  %s861_s28 = sphi %s926_s28, %s1053_s28  }
   0x7   : > { %s951_s9 = sadd.s32 1, %s873_s8   ;;  %s181_s10 = sadd.s32 1, %s869_s30 }
   0x8   : > { %s178_s11 = ssub.s32 %s873_s8, %s951_s9  ;;  %p191_p0 = scmp.ne.s32.totalorder %s869_s30, %s865_s29 }
   0x9   : > { %p179_p1 = scmp.eq.s32.totalorder %s178_s11, 0  ;;  %p192_p2 = scmp.eq.s32.totalorder %s947_s5, 1 }
   0xa   : > { %p197_p3 = scmp.ne.s32.totalorder %s865_s29, %s861_s28  ;;  %p198_p4 = scmp.eq.s32.totalorder %s704_s6, 1 }
   0xb   : > { %s962_s12 = scalar_select %p179_p1, %s869_s30, %s181_s10  }
   0xc   : > { %p964_p5 = por %p192_p2, %p191_p0  ;;  %p968_p6 = por %p198_p4, %p197_p3 }
   0xd   : > { %p707_p7 = scmp.ge.s32.totalorder %s873_s8, 1  ;;  %p242_p8 = scmp.lt.s32.totalorder %s873_s8, 3 }
   0xf   : > { %p243_p9 = pnand %p707_p7, %p242_p8 }
  0x10   : > { %p274_p10 = scmp.lt.s32.totalorder (!%p243_p9), %s947_s5, 1  ;;  %v875_v0 = vmov (!%p243_p9), 0   ;;  %vm303_vm0 = vcmask (!%p243_p9), 1041408   ;;  %v798_v6 = vld [vmem:[%s1044_s1] sm:$0xff] (!%p243_p9)   ;;  %vm299_vm1 = vcmask (!%p243_p9), 31744   ;;  %s280_s22 = sld [smem:[#allocation2]] (!%p243_p9) }
  0x11   : > { %246 = sbr.rel (%p243_p9) target bundleno = 1261 (0x4ed), region = 48  ;;  %342 = vmatprep.mubr.bf16.mxu0 (!%p243_p9), %v875_v0  ;;  %795 = vset.pattern.permute.xlu1 (!%p243_p9), %v875_v0  ;;  %v876_v22 = vmov (!%p243_p9), 0.0|0.0   ;;  %vm877_vm6 = vmmov (!%p243_p9), 0   ;;  %v878_v23 = vmov (!%p243_p9), 0.0   ;;  %v284_v29 = vld [vmem:[%s1045_s2] sm:$0x1] (!%p243_p9) }
  0x12   : > { %796 = vset.pattern.permute.xlu0 (!%p243_p9), %v875_v0  ;;  %749 = vmatprep.subr.bf16.mxu1 (!%p243_p9), %v876_v22  ;;  %vm375_vm7 = vcmask (!%p243_p9), 130048   ;;  %v285_v30 = vld [vmem:[%s1046_s3] sm:$0xff] (!%p243_p9)  ;;  %vm456_vm8 = vcmask (!%p243_p9), 7168   ;;  %vm463_vm9 = vcmask (!%p243_p9), 1040384   ;;  %v286_v38 = vld [vmem:[%s1046_s3 + $0x8] sm:$0xff] (!%p243_p9)  ;;  %s730_s18 = sshll.u32 (!%p243_p9), %s947_s5, 7 }
  0x13   : > { %741 = vmatprep.mubr.msk.f32.mxu1 (!%p243_p9), %vm877_vm6, %v878_v23  ;;  %v287_v57 = vld [vmem:[%s1047_s4] sm:$0xf] (!%p243_p9)  ;;  %s1001_s23 = scalar_lea.hbm (!%p243_p9), %s1050_s7, %s730_s18 }
  0x16   : > { %v357_v7 = vstv (!%p243_p9), %s280_s22 }
  0x18   : > { %s275_s15 = scalar_select %p274_p10, %s947_s5, 1 }
  0x19   : > { %s879_s5 = smov [#allocation4]  }
  0x1a   : > { %s728_s16 = sshll.u32 %s275_s15, 3  ;;  %s281_s15 = sld [smem:[#allocation3]] }
  0x1b   : > { %s278_s19 = scalar_lea.vmem %s1043_s0, %s728_s16  ;;  %s271_s16 = sand.u32 1, %s865_s29  }
  0x1c   : > { %v288_v1 = vld [vmem:[%s278_s19] sm:$0xff]  ;;  %s708_s17 = sshll.u32 %s271_s16, 3  ;;  %s631_s24 = scalar_lea.sflag [#allocation5], %s271_s16 }
  0x1d   : > { %v290_v2 = vcombine.high %v288_v1, %v288_v1  ;;  %v292_v3 = vpack.c.bf16 %v288_v1, %v288_v1  ;;  %s273_s19 = scalar_lea.vmem [#allocation4], %s708_s17  ;;  %s815_s26 = sshll.u32 %s879_s5, 4  ;;  %s816_s26 = int_to_ptr.vmem [resolvable:$false] %s815_s26 }
  0x1e   : > { %s645_s20 = sshll.u32 %s273_s19, 4  ;;  %s817_s27 = scalar_lea.vmem %s816_s26, 256  ;;  %s1003_s20 = int_to_ptr.vmem [resolvable:$true] %s645_s20 }
  0x1f   : > { %v293_v4 = vpack.c.bf16 %v290_v2, %v290_v2  ;;  %v305_v5 = vsel %vm303_vm0, %v292_v3, 0  ;;  %s811_s25 = scalar_lea.vmem %s1003_s20, 128  ;;  %p818_p0 = scmp.lt.s32.totalorder %s1003_s20, %s816_s26 }
  0x20   : > { %v616_v58 = vstv %s281_s15  ;;  %p812_p11 = scmp.ne.s32.totalorder %s1003_s20, %s811_s25  ;;  %p819_p1 = scmp.lt.s32.totalorder %s817_s27, %s811_s25 }
  0x21   : > { %712 = vmatprep.subr.msk.bf16.mxu0 %vm303_vm0, %v293_v4 }
  0x22   : > { %311 = vmatpush1.bf16.msra.mxu0 %v305_v5  ;;  %p813_p12 = pnand %p812_p11, %p964_p5  ;;  %p820_p2 = por %p819_p1, %p818_p0 }
  0x24   : > { %p814_p13 = pneg %p813_p12 }
  0x25   : > { %713 = vmatmul.mubr.msk.bf16.vlgmr.msra.gmra.mrb[0].mxu0 %vm299_vm1, %v798_v6 }
  0x26   : > { %605 = vmatprep.mubr.bf16.mxu0 %v875_v0  ;;  %p821_p3 = pnand %p820_p2, %p814_p13 }
  0xf8   : > { %v344_v8 = vpop.f32.mrb[0].mxu0 }
  0xf9   : > { %v358_v9 = vmul.f32 %v357_v7, %v344_v8  ;;  %v346_v10 = vpop.f32.mrb[1].mxu0  ;;  %vm353_vm2 = vcmp.ge.f32.partialorder %v344_v8, 0.0 }
  0xfa   : > { %v359_v11 = vmul.f32 %v357_v7, %v346_v10  ;;  %v348_v12 = vpop.f32.mrb[2].mxu0  ;;  %vm354_vm3 = vcmp.ge.f32.partialorder %v346_v10, 0.0 }
  0xfb   : > { %vm355_vm4 = vcmp.ge.f32.partialorder %v348_v12, 0.0  ;;  %v360_v13 = vmul.f32 %v357_v7, %v348_v12  ;;  %v350_v14 = vpop.f32.mrb[3].mxu0  ;;  %v362_v15 = vsel %vm353_vm2, %v344_v8, %v358_v9 }
  0xfc   : > { %vm356_vm5 = vcmp.ge.f32.partialorder %v350_v14, 0.0  ;;  %v361_v16 = vmul.f32 %v357_v7, %v350_v14  ;;  %v363_v17 = vsel %vm354_vm3, %v346_v10, %v359_v11 }
  0xfd   : > { %v366_v18 = vadd.f32 %v363_v17, %v362_v15  ;;  %v364_v19 = vsel %vm355_vm4, %v348_v12, %v360_v13 }
  0xfe   : > { %v365_v20 = vsel %vm356_vm5, %v350_v14, %v361_v16 }
  0xff   : > { %367 = vadd.xlane.f32.xlu0 %v366_v18  ;;  %v369_v21 = vadd.f32 %v365_v20, %v364_v19 }
 0x103   : > { %370 = vadd.xlane.f32.xlu0 %v369_v21 }
 0x18c   : > { %v368_v24 = vpop.xlane.xlu0 %367 }
 0x18d   : > { %v373_v26 = vmul.f32 0.00390625, %v368_v24 }
 0x190   : > { %v371_v25 = vpop.xlane.xlu0 %370 }
 0x191   : > { %v374_v27 = vmul.f32 0.00390625, %v371_v25 }
 0x193   : > { %v750_v28 = vpack.c.bf16 %v374_v27, %v373_v26 }
 0x195   : > { %751 = vmatpush3.bf16.msra.mxu1 %v750_v28 }
 0x198   : > { %742 = vmatmul.mubr.msk.f32.vlgmr.msra.gmra.mrb[0].mxu1 %vm375_vm7, %v284_v29 }
 0x199   : > { %746 = vmatprep.mubr.msk.f32.mxu1 %vm456_vm8, %v285_v30 }
 0x26b   : > { %v445_v31 = vpop.f32.mrb[0].mxu1 }
 0x26c   : > { %v715_v32 = vmul.f32 -1.442695, %v445_v31  ;;  %v743_v33 = vpop.f32.mrb[1].mxu1 }
 0x26e   : > { %799 = vpow2.f32 %v715_v32 }
 0x278   : > { %v800_v34 = vpop.eup %799 }
 0x279   : > { %v452_v35 = vadd.f32 1.0, %v800_v34 }
 0x27b   : > { %801 = vrcp.f32 %v452_v35 }
 0x285   : > { %v802_v36 = vpop.eup %801 }
 0x286   : > { %v455_v37 = vmul.f32 %v802_v36, %v445_v31 }
 0x288   : > { %744 = vmatprep.subr.msk.mxu1 %vm463_vm9, %v455_v37 }
 0x289   : > { %745 = vmatpush3.msk.msra.mxu1 %vm463_vm9, %v455_v37 }
 0x28a   : > { %747 = vmatmul.mubr.msk.f32.vlgmr.msra.gmra.mrb[2].mxu1 %vm456_vm8, %v286_v38 }
 0x35d   : > { %v748_v39 = vpop.f32.mrb[2].mxu1 }
 0x35e   : > { %v720_v40 = vmul.f32 -1.442695, %v748_v39  ;;  %v533_v41 = vpop.f32.mrb[3].mxu1 }
 0x35f   : > { %v719_v42 = vmul.f32 -1.442695, %v533_v41 }
 0x360   : > { %803 = vpow2.f32 %v720_v40 }
 0x361   : > { %805 = vpow2.f32 %v719_v42 }
 0x36a   : > { %v804_v43 = vpop.eup %803 }
 0x36b   : > { %v806_v44 = vpop.eup %805  ;;  %v549_v46 = vadd.f32 1.0, %v804_v43 }
 0x36c   : > { %v548_v45 = vadd.f32 1.0, %v806_v44 }
 0x36e   : > { %807 = vrcp.f32 %v548_v45 }
 0x36f   : > { %809 = vrcp.f32 %v549_v46 }
 0x378   : > { %v808_v47 = vpop.eup %807 }
 0x379   : > { %556 = vperm.xlu1 %795, %v808_v47   ;;  %v810_v48 = vpop.eup %809 }
 0x37d   : > { %561 = vperm.xlu1 %795, %v810_v48  }
 0x3f8   : > { %v557_v49 = vpop.permute.xlu1 %556 }
 0x3f9   : > { %v564_v51 = vmul.f32 %v557_v49, %v362_v15  ;;  %v565_v52 = vmul.f32 %v557_v49, %v363_v17 }
 0x3fc   : > { %v562_v50 = vpop.permute.xlu1 %561 }
 0x3fd   : > { %v566_v53 = vmul.f32 %v562_v50, %v364_v19  ;;  %v567_v54 = vmul.f32 %v562_v50, %v365_v20 }
 0x3ff   : > { %v568_v55 = vpack.c.bf16 %v566_v53, %v564_v51  ;;  %v569_v56 = vpack.c.bf16 %v567_v54, %v565_v52 }
 0x401   : > { %573 = vmatprep.subr.bf16.mxu0 %v569_v56 }
 0x402   : > { %574 = vmatpush1.bf16.msra.mxu0 %v568_v55 }
 0x405   : > { %721 = vmatmul.mubr.msk.bf16.vlgmr.msra.gmra.mrb[4].mxu0 %vm375_vm7, %v287_v57 }
 0x4d8   : > { %v607_v59 = vpop.f32.mrb[4].mxu0 }
 0x4d9   : > { %vm614_vm10 = vcmp.ge.f32.partialorder %v607_v59, 0.0  ;;  %v617_v60 = vmul.f32 %v616_v58, %v607_v59  ;;  %v609_v61 = vpop.f32.mrb[5].mxu0 }
 0x4da   : > { %vm615_vm11 = vcmp.ge.f32.partialorder %v609_v61, 0.0  ;;  %v618_v62 = vmul.f32 %v616_v58, %v609_v61  ;;  %v611_v63 = vpop.f32.mrb[6].mxu0 }
 0x4db   : > { %v619_v0 = vsel %vm614_vm10, %v607_v59, %v617_v60  ;;  %v612_v1 = vpop.f32.mrb[7].mxu0 }
 0x4dc   : > { %v620_v2 = vsel %vm615_vm11, %v609_v61, %v618_v62 }
 0x4dd   : > { %v729_v3 = vpack.c.bf16 %v620_v2, %v619_v0 }
 0x4df   : > { %629 = vst [vmem:[%s273_s19] sm:$0xff] %v729_v3 }
 0x4e0   : > { %824 = shalt.err (!%p821_p3)
}
 0x4e1   : > { %s825_s6 = scalar_lea.hbm %s1001_s23, 128  ;;  %s829_s15 = scalar_lea.hbm %s1050_s7, 256 }
 0x4e2   : > { %p826_p4 = scmp.ne.s32.totalorder %s1001_s23, %s825_s6  ;;  %p830_p9 = scmp.lt.u32.totalorder %s1001_s23, %s1050_s7 }
 0x4e3   : > { %p831_p10 = scmp.lt.u32.totalorder %s829_s15, %s825_s6  ;;  %p833_p12 = scmp.lt.u32.totalorder %s825_s6, %s1001_s23 }
 0x4e4   : > { %p827_p7 = pnand %p826_p4, %p964_p5 }
 0x4e5   : > { %p832_p11 = por %p831_p10, %p830_p9 }
 0x4e6   : > { %p828_p8 = pneg %p827_p7 }
 0x4e7   : > { %p834_p13 = por %p833_p12, %p832_p11 }
 0x4e9   : > { %p835_p0 = pnand %p834_p13, %p828_p8 }
 0x4eb   : > { %838 = shalt.err (!%p835_p0)
}
 0x4ec   : > { %752 = dma.vmem_to_hbm [thread:$0]  (%p964_p5), %s1003_s20, 128, %s1001_s23, %s631_s24  }
 0x4ed PF: > { %p758_p1 = scmp.ge.s32.totalorder %s873_s8, 2  ;;  %s657_s18 = sand.u32 1, %s861_s28  }
 0x4ee   : > { %s658_s19 = scalar_lea.sflag [#allocation5], %s657_s18 }
 0x4ef   : > { %p755_p2 = pnand %p758_p1, %p968_p6 }
 0x4f1   : > { %856 = dma.done.wait (!%p755_p2), %s658_s19, 128  }
 0x4f2   : > { %858 = vsyncadd (!%p755_p2), %s658_s19, 4294967168  ;;  %p19_p3 = scmp.ge.s32.totalorder %s951_s9, 4   ;;  %s1053_s28 = smov %s865_s29 }
 0x4f3   : > { %s1054_s29 = smov %s869_s30  ;;  %s1055_s30 = smov %s962_s12 }
 0x4f4   : > { %s1056_s8 = smov %s951_s9  ;;  %21 = sbr.rel (!%p19_p3) target bundleno = 6 (0x6), region = 83 }
 0x4fb   :  { %663 = vsyncpa [#allocation5], 1 }
 0x4fc   :  { %665 = vsyncpa [#allocation5 + $0x1], 1 }

</bundles_post_ra>
